<compile_context>
chip_gen: v7x
topology: tpu7x:2x2x1
jax: 0.10.0
libtpu: 0.0.40
codegen_flags: <defaults>
</compile_context>

<pallas_src>
import jax
import jax.numpy as jnp
from jax import lax
from jax.experimental import pallas as pl
from jax.experimental.pallas import tpu as pltpu

OBS_DIM = 5
ACT_DIM = 3
HIDDEN = 512
BLOCK_B_MAX = 512      # batch-tile cap: keeps per-step f32 activations ~1 MiB


def _mlp_kernel(s1_ref, s2_ref, w1_ref, b1_ref, w2_ref, b2_ref, w3t_ref, b3t_ref, o_ref):
    # x = (state2 - state1) / 0.1  -- the 10x scale is pre-folded into w1.
    x = s2_ref[...] - s1_ref[...]                                   # (TB, 5) f32

    # linear1 + ReLU  (K = 5; Mosaic pads the contraction dim; tiny matmul)
    h = jnp.dot(x, w1_ref[...], preferred_element_type=jnp.float32) + b1_ref[...]
    h = jnp.maximum(h, 0.0)                                         # (TB, 512) f32

    # linear2 + ReLU  (bf16 x bf16, f32 accumulation)
    h = jnp.dot(h.astype(w2_ref.dtype), w2_ref[...],
                preferred_element_type=jnp.float32) + b2_ref[...]
    h = jnp.maximum(h, 0.0)                                         # (TB, 512) f32

    # linear_out, transposed: contract the 512 dim of (3,512) w3^T with the
    # 512 dim of (TB,512) h -> (3, TB).  Batch stays on the lane axis, so the
    # store is lane-dense and no transpose of h is needed.
    out_t = lax.dot_general(
        w3t_ref[...], h.astype(w3t_ref.dtype),
        dimension_numbers=(((1,), (1,)), ((), ())),
        preferred_element_type=jnp.float32)                         # (3, TB) f32
    o_ref[...] = out_t + b3t_ref[...]                               # bias (3, 1) broadcast


def init_params(key, observation_dim=OBS_DIM, action_dim=ACT_DIM, hidden=HIDDEN):
    """Deterministic synthetic parameters (PyTorch-Linear-like uniform init), f32."""
    ks = jax.random.split(key, 6)

    def lin(kw, kb, fan_in, fan_out):
        bound = 1.0 / jnp.sqrt(fan_in)
        w = jax.random.uniform(kw, (fan_in, fan_out), jnp.float32, -bound, bound)
        b = jax.random.uniform(kb, (fan_out,), jnp.float32, -bound, bound)
        return w, b

    w1, b1 = lin(ks[0], ks[1], observation_dim, hidden)
    w2, b2 = lin(ks[2], ks[3], hidden, hidden)
    w3, b3 = lin(ks[4], ks[5], hidden, action_dim)
    return dict(w1=w1, b1=b1, w2=w2, b2=b2, w3=w3, b3=b3)


def prepare_params(params, weight_dtype=jnp.bfloat16):
    """One-time packing for the kernel (NOT in the per-call path)."""
    f32 = jnp.float32
    w1 = params["w1"].astype(f32) * 10.0                        # (5, 512), /0.1 folded in
    b1 = params["b1"].reshape(1, HIDDEN).astype(f32)
    w2 = params["w2"].astype(weight_dtype)                      # (512, 512) bf16
    b2 = params["b2"].reshape(1, HIDDEN).astype(f32)
    w3t = params["w3"].T.astype(weight_dtype)                   # (3, 512) bf16, transposed
    b3t = params["b3"].reshape(ACT_DIM, 1).astype(f32)          # (3, 1)
    return dict(w1=w1, b1=b1, w2=w2, b2=b2, w3t=w3t, b3t=b3t)


def _choose_block_b(batch, block_b_max=BLOCK_B_MAX):
    """Batch tile size.  For B > 128 force at least 2 grid steps (so v7x's two
    TensorCores both get work) with tiles that are multiples of 128 so the
    (ACT_DIM, tb) output block stays lane-aligned."""
    if batch <= 128:
        return batch                               # single full-dim block
    half = (batch + 1) // 2
    tb = ((half + 127) // 128) * 128
    return max(128, min(block_b_max, tb))


def action_optimizer_forward(state1, state2, prep, *, block_b=None):
    """Pallas forward. state1, state2: (B, 5) -> (B, 3) float32."""
    B = state1.shape[0]
    state1 = state1.astype(jnp.float32)
    state2 = state2.astype(jnp.float32)

    tb = block_b if block_b is not None else _choose_block_b(B)
    grid = (pl.cdiv(B, tb),)

    state_spec = pl.BlockSpec((tb, OBS_DIM), lambda i: (i, 0))

    def resident(shape):
        # Constant index_map: weights/biases stay VMEM-resident across the whole
        # batch grid; Buffered(1) skips the never-used second pipeline buffer.
        return pl.BlockSpec(shape, lambda i: (0, 0), pipeline_mode=pl.Buffered(1))

    out_t = pl.pallas_call(
        _mlp_kernel,
        out_shape=jax.ShapeDtypeStruct((ACT_DIM, B), jnp.float32),
        grid_spec=pltpu.PrefetchScalarGridSpec(
            num_scalar_prefetch=0,
            grid=grid,
            in_specs=[
                state_spec,                          # state1 (TB, 5)
                state_spec,                          # state2 (TB, 5)
                resident((OBS_DIM, HIDDEN)),         # w1 (scale folded in)
                resident((1, HIDDEN)),               # b1
                resident((HIDDEN, HIDDEN)),          # w2 (bf16)
                resident((1, HIDDEN)),               # b2
                resident((ACT_DIM, HIDDEN)),         # w3^T (bf16)
                resident((ACT_DIM, 1)),              # b3^T
            ],
            out_specs=pl.BlockSpec((ACT_DIM, tb), lambda i: (0, i)),
        ),
        compiler_params=pltpu.CompilerParams(
            dimension_semantics=("parallel",),       # batch grid shards across v7x's 2 TCs
            vmem_limit_bytes=32 * 1024 * 1024,       # explicit (v5e default is only 16 MiB)
        ),
    )(state1, state2, prep["w1"], prep["b1"], prep["w2"], prep["b2"],
      prep["w3t"], prep["b3t"])

    # Kernel writes (ACT_DIM, B) lane-dense; tiny transpose restores (B, 3).
    return out_t.T


def _reference_forward_f32(state1, state2, params):
    """Pure-f32 reference matching the PyTorch module exactly."""
    x = (state2 - state1) / 0.1
    h = jnp.maximum(x @ params["w1"] + params["b1"], 0.0)
    h = jnp.maximum(h @ params["w2"] + params["b2"], 0.0)
    return h @ params["w3"] + params["b3"]


def _reference_forward_mirrored(state1, state2, prep):
    """Plain-JAX reference using the same folded scale + bf16 quantization as the kernel."""
    x = state2.astype(jnp.float32) - state1.astype(jnp.float32)
    h = jnp.maximum(x @ prep["w1"] + prep["b1"], 0.0)
    h = jnp.dot(h.astype(prep["w2"].dtype), prep["w2"],
                preferred_element_type=jnp.float32) + prep["b2"]
    h = jnp.maximum(h, 0.0)
    out = jnp.dot(h.astype(prep["w3t"].dtype), prep["w3t"].T,
                  preferred_element_type=jnp.float32) + prep["b3t"][:, 0]
    return out


if __name__ == "__main__":
    key = jax.random.PRNGKey(0)
    kp, k1, k2, k3, k4 = jax.random.split(key, 5)

    params = init_params(kp)
    prep = prepare_params(params)   # one-time; NOT in the per-call path

    # --- small batch (single grid step, full-dim blocks) ---
    B = 8
    state1 = jax.random.normal(k1, (B, OBS_DIM), jnp.float32)
    state2 = jax.random.normal(k2, (B, OBS_DIM), jnp.float32)

    out = jax.block_until_ready(action_optimizer_forward(state1, state2, prep))
    assert out.shape == (B, ACT_DIM)

    ref_mirror = _reference_forward_mirrored(state1, state2, prep)
    assert jnp.allclose(out, ref_mirror, atol=5e-3, rtol=5e-3), \
        f"mismatch vs mirrored ref: {jnp.max(jnp.abs(out - ref_mirror))}"

    ref_f32 = _reference_forward_f32(state1, state2, params)
    assert jnp.allclose(out, ref_f32, atol=7.5e-2, rtol=7.5e-2), \
        f"mismatch vs f32 ref: {jnp.max(jnp.abs(out - ref_f32))}"

    # --- batched-candidates shape: multi-step grid (both v7x cores), partial last tile ---
    B2 = 260
    s1b = jax.random.normal(k3, (B2, OBS_DIM), jnp.float32)
    s2b = jax.random.normal(k4, (B2, OBS_DIM), jnp.float32)

    out2 = jax.block_until_ready(action_optimizer_forward(s1b, s2b, prep))
    assert out2.shape == (B2, ACT_DIM)

    ref2 = _reference_forward_mirrored(s1b, s2b, prep)
    assert jnp.allclose(out2, ref2, atol=5e-3, rtol=5e-3), \
        f"batched mismatch vs mirrored ref: {jnp.max(jnp.abs(out2 - ref2))}"

    print("KERNEL_OK")
</pallas_src>

<mosaic_0001>
module attributes {stable_mosaic.version = 11 : i64} {
  func.func @_mlp_kernel(%arg0: i32, %arg1: memref<8x5xf32, #tpu.memory_space<vmem>>, %arg2: memref<8x5xf32, #tpu.memory_space<vmem>>, %arg3: memref<5x512xf32, #tpu.memory_space<vmem>>, %arg4: memref<1x512xf32, #tpu.memory_space<vmem>>, %arg5: memref<512x512xbf16, #tpu.memory_space<vmem>>, %arg6: memref<1x512xf32, #tpu.memory_space<vmem>>, %arg7: memref<3x512xbf16, #tpu.memory_space<vmem>>, %arg8: memref<3x1xf32, #tpu.memory_space<vmem>>, %arg9: memref<3x8xf32, #tpu.memory_space<vmem>>) attributes {dimension_semantics = [#tpu.dimension_semantics<parallel>], iteration_bounds = array<i64: 1>, scalar_prefetch = 0 : i64, scratch_operands = 0 : i64, tpu.core_type = #tpu.core_type<tc>, window_params = [{transform_indices = @transform_0, window_bounds = array<i64: 8, 5>}, {transform_indices = @transform_1, window_bounds = array<i64: 8, 5>}, {pipeline_mode = #tpu.pipeline_mode<synchronous>, transform_indices = @transform_2, window_bounds = array<i64: 5, 512>}, {pipeline_mode = #tpu.pipeline_mode<synchronous>, transform_indices = @transform_3, window_bounds = array<i64: 1, 512>}, {pipeline_mode = #tpu.pipeline_mode<synchronous>, transform_indices = @transform_4, window_bounds = array<i64: 512, 512>}, {pipeline_mode = #tpu.pipeline_mode<synchronous>, transform_indices = @transform_5, window_bounds = array<i64: 1, 512>}, {pipeline_mode = #tpu.pipeline_mode<synchronous>, transform_indices = @transform_6, window_bounds = array<i64: 3, 512>}, {pipeline_mode = #tpu.pipeline_mode<synchronous>, transform_indices = @transform_7, window_bounds = array<i64: 3, 1>}, {transform_indices = @transform_8, window_bounds = array<i64: 3, 8>}]} {
    %c0 = arith.constant 0 : index
    %c0_0 = arith.constant 0 : index
    %0 = vector.load %arg2[%c0, %c0_0] : memref<8x5xf32, #tpu.memory_space<vmem>>, vector<8x5xf32>
    %c0_1 = arith.constant 0 : index
    %c0_2 = arith.constant 0 : index
    %1 = vector.load %arg1[%c0_1, %c0_2] : memref<8x5xf32, #tpu.memory_space<vmem>>, vector<8x5xf32>
    %2 = arith.subf %0, %1 : vector<8x5xf32>
    %c0_3 = arith.constant 0 : index
    %c0_4 = arith.constant 0 : index
    %3 = vector.load %arg3[%c0_3, %c0_4] : memref<5x512xf32, #tpu.memory_space<vmem>>, vector<5x512xf32>
    %cst = arith.constant dense<0.000000e+00> : vector<8x512xf32>
    %4 = tpu.matmul %2, %3, %cst {dimension_numbers = #tpu.dot_dimension_numbers<[1], [0], [0], [1], [0, 0, 1, 1], [], []>} : vector<8x5xf32>, vector<5x512xf32>, vector<8x512xf32> -> vector<8x512xf32>
    %c0_5 = arith.constant 0 : index
    %c0_6 = arith.constant 0 : index
    %5 = vector.load %arg4[%c0_5, %c0_6] : memref<1x512xf32, #tpu.memory_space<vmem>>, vector<1x512xf32>
    %6 = vector.broadcast %5 : vector<1x512xf32> to vector<8x512xf32>
    %7 = arith.addf %4, %6 : vector<8x512xf32>
    %cst_7 = arith.constant 0.000000e+00 : f32
    %8 = vector.broadcast %cst_7 : f32 to vector<8x512xf32>
    %9 = arith.maximumf %7, %8 : vector<8x512xf32>
    %10 = arith.truncf %9 : vector<8x512xf32> to vector<8x512xbf16>
    %c0_8 = arith.constant 0 : index
    %c0_9 = arith.constant 0 : index
    %11 = vector.load %arg5[%c0_8, %c0_9] : memref<512x512xbf16, #tpu.memory_space<vmem>>, vector<512x512xbf16>
    %cst_10 = arith.constant dense<0.000000e+00> : vector<8x512xf32>
    %12 = tpu.matmul %10, %11, %cst_10 {dimension_numbers = #tpu.dot_dimension_numbers<[1], [0], [0], [1], [0, 0, 1, 1], [], []>} : vector<8x512xbf16>, vector<512x512xbf16>, vector<8x512xf32> -> vector<8x512xf32>
    %c0_11 = arith.constant 0 : index
    %c0_12 = arith.constant 0 : index
    %13 = vector.load %arg6[%c0_11, %c0_12] : memref<1x512xf32, #tpu.memory_space<vmem>>, vector<1x512xf32>
    %14 = vector.broadcast %13 : vector<1x512xf32> to vector<8x512xf32>
    %15 = arith.addf %12, %14 : vector<8x512xf32>
    %cst_13 = arith.constant 0.000000e+00 : f32
    %16 = vector.broadcast %cst_13 : f32 to vector<8x512xf32>
    %17 = arith.maximumf %15, %16 : vector<8x512xf32>
    %c0_14 = arith.constant 0 : index
    %c0_15 = arith.constant 0 : index
    %18 = vector.load %arg7[%c0_14, %c0_15] : memref<3x512xbf16, #tpu.memory_space<vmem>>, vector<3x512xbf16>
    %19 = arith.truncf %17 : vector<8x512xf32> to vector<8x512xbf16>
    %cst_16 = arith.constant dense<0.000000e+00> : vector<3x8xf32>
    %20 = tpu.matmul %18, %19, %cst_16 {dimension_numbers = #tpu.dot_dimension_numbers<[1], [1], [0], [0], [0, 0, 1, 0], [], []>} : vector<3x512xbf16>, vector<8x512xbf16>, vector<3x8xf32> -> vector<3x8xf32>
    %c0_17 = arith.constant 0 : index
    %c0_18 = arith.constant 0 : index
    %21 = vector.load %arg8[%c0_17, %c0_18] : memref<3x1xf32, #tpu.memory_space<vmem>>, vector<3x1xf32>
    %22 = vector.broadcast %21 : vector<3x1xf32> to vector<3x8xf32>
    %23 = arith.addf %20, %22 : vector<3x8xf32>
    %c0_19 = arith.constant 0 : index
    %c0_20 = arith.constant 0 : index
    %24 = vector.load %arg9[%c0_19, %c0_20] : memref<3x8xf32, #tpu.memory_space<vmem>>, vector<3x8xf32>
    tpu.vector_store %arg9[%c0_19, %c0_20], %23 {strides = array<i32>} : memref<3x8xf32, #tpu.memory_space<vmem>>, vector<3x8xf32>,
    return
  }
  func.func @transform_0(%arg0: i32) -> (i32, i32) {
    %c0_i32 = arith.constant 0 : i32
    %c0_i32_0 = arith.constant 0 : i32
    return %arg0, %c0_i32 : i32, i32
  }
  func.func @transform_1(%arg0: i32) -> (i32, i32) {
    %c0_i32 = arith.constant 0 : i32
    %c0_i32_0 = arith.constant 0 : i32
    return %arg0, %c0_i32 : i32, i32
  }
  func.func @transform_2(%arg0: i32) -> (i32, i32) {
    %c0_i32 = arith.constant 0 : i32
    %c0_i32_0 = arith.constant 0 : i32
    %c0_i32_1 = arith.constant 0 : i32
    return %c0_i32, %c0_i32_0 : i32, i32
  }
  func.func @transform_3(%arg0: i32) -> (i32, i32) {
    %c0_i32 = arith.constant 0 : i32
    %c0_i32_0 = arith.constant 0 : i32
    %c0_i32_1 = arith.constant 0 : i32
    return %c0_i32, %c0_i32_0 : i32, i32
  }
  func.func @transform_4(%arg0: i32) -> (i32, i32) {
    %c0_i32 = arith.constant 0 : i32
    %c0_i32_0 = arith.constant 0 : i32
    %c0_i32_1 = arith.constant 0 : i32
    return %c0_i32, %c0_i32_0 : i32, i32
  }
  func.func @transform_5(%arg0: i32) -> (i32, i32) {
    %c0_i32 = arith.constant 0 : i32
    %c0_i32_0 = arith.constant 0 : i32
    %c0_i32_1 = arith.constant 0 : i32
    return %c0_i32, %c0_i32_0 : i32, i32
  }
  func.func @transform_6(%arg0: i32) -> (i32, i32) {
    %c0_i32 = arith.constant 0 : i32
    %c0_i32_0 = arith.constant 0 : i32
    %c0_i32_1 = arith.constant 0 : i32
    return %c0_i32, %c0_i32_0 : i32, i32
  }
  func.func @transform_7(%arg0: i32) -> (i32, i32) {
    %c0_i32 = arith.constant 0 : i32
    %c0_i32_0 = arith.constant 0 : i32
    %c0_i32_1 = arith.constant 0 : i32
    return %c0_i32, %c0_i32_0 : i32, i32
  }
  func.func @transform_8(%arg0: i32) -> (i32, i32) {
    %c0_i32 = arith.constant 0 : i32
    %c0_i32_0 = arith.constant 0 : i32
    return %c0_i32, %arg0 : i32, i32
  }
}

</mosaic_0001>

<bundles_post_ra>
// kernel: tpu_custom_call.1
= control target key start
LH: loop header
LB: loop body
LE: loop exit
PB: predicated region body
PF: predicated region fallthrough
CT: control target
= control target key end

     0   :  { %13 = vsyncpa [#allocation3], 0  ;;  %s1998_s0 = inlined_call_operand.hbm [shape: f32[8,5], index: 0, kind: input, shape index: {}]   ;;  %s1999_s1 = inlined_call_operand.vmem [shape: f32[8,5], index: 1, kind: input, shape index: {}]   ;;  %s2000_s2 = inlined_call_operand.hbm [shape: f32[5,512], index: 2, kind: input, shape index: {}]   ;;  %s2001_s3 = inlined_call_operand.hbm [shape: f32[1,512], index: 3, kind: input, shape index: {}]   ;;  %s2002_s4 = inlined_call_operand.hbm [shape: bf16[512,512], index: 4, kind: input, shape index: {}]   ;;  %s2003_s5 = inlined_call_operand.vmem [shape: f32[1,512], index: 5, kind: input, shape index: {}]   ;;  %s2004_s6 = inlined_call_operand.vmem [shape: bf16[3,512], index: 6, kind: input, shape index: {}]   ;;  %s2005_s7 = inlined_call_operand.vmem [shape: f32[3,1], index: 7, kind: input, shape index: {}]   ;;  %s2006_s8 = inlined_call_operand.hbm [shape: f32[3,8], index: 8, kind: output, shape index: {}]  }
   0x1   :  { %14 = vsyncpa [#allocation6], 0 }
   0x2   :  { %15 = vsyncpa [#allocation9], 0 }
   0x3   :  { %16 = vsyncpa [#allocation4], 0  ;;  %s1836_s27 = smov [#allocation5]   ;;  %s1837_s29 = smov [#allocation2]  }
   0x4   :  { %s35_s28 = sshll.u32 %s1836_s27, 4  ;;  %s23_s30 = sshll.u32 %s1837_s29, 4  ;;  %s36_s28 = int_to_ptr.vmem [resolvable:$true] %s35_s28  ;;  %s24_s30 = int_to_ptr.vmem [resolvable:$true] %s23_s30 }
   0x5   :  { %s1718_s11 = scalar_lea.hbm %s2000_s2, 512 }
   0x6   :  { %p1719_p0 = scmp.ne.s32.totalorder %s2000_s2, %s1718_s11  ;;  %p1722_p1 = scmp.lt.u32.totalorder %s1718_s11, %s2000_s2 }
   0x8   :  { %p1724_p2 = pnand %p1722_p1, %p1719_p0 }
   0xa   :  { %1727 = shalt.err (!%p1724_p2)
}
   0xb   :  { %s1728_s16 = scalar_lea.vmem %s36_s28, 512  ;;  %p1733_p4 = scmp.lt.s32.totalorder %s36_s28, %s36_s28 }
   0xc   :  { %p1729_p3 = scmp.ne.s32.totalorder %s36_s28, %s1728_s16  ;;  %p1734_p5 = scmp.lt.s32.totalorder %s1728_s16, %s1728_s16 }
   0xe   :  { %p1735_p6 = por %p1734_p5, %p1733_p4 }
  0x10   :  { %p1736_p7 = pnand %p1735_p6, %p1729_p3 }
  0x12   :  { %1739 = shalt.err (!%p1736_p7)
}
  0x13   :  { %38 = dma.hbm_to_vmem [thread:$0]  %s2000_s2, 512, %s36_s28, [#allocation6]  }
  0x14   :  { %s1740_s21 = scalar_lea.hbm %s1998_s0, 128 }
  0x15   :  { %p1741_p8 = scmp.ne.s32.totalorder %s1998_s0, %s1740_s21  ;;  %p1744_p9 = scmp.lt.u32.totalorder %s1740_s21, %s1998_s0 }
  0x17   :  { %p1746_p10 = pnand %p1744_p9, %p1741_p8 }
  0x19   :  { %1749 = shalt.err (!%p1746_p10)
}
  0x1a   :  { %s1750_s26 = scalar_lea.vmem %s24_s30, 128  ;;  %p1755_p12 = scmp.lt.s32.totalorder %s24_s30, %s24_s30 }
  0x1b   :  { %p1751_p11 = scmp.ne.s32.totalorder %s24_s30, %s1750_s26  ;;  %p1756_p13 = scmp.lt.s32.totalorder %s1750_s26, %s1750_s26 }
  0x1d   :  { %p1757_p0 = por %p1756_p13, %p1755_p12 }
  0x1f   :  { %p1758_p1 = pnand %p1757_p0, %p1751_p11 }
  0x21   :  { %1761 = shalt.err (!%p1758_p1)
}
  0x22   :  { %26 = dma.hbm_to_vmem [thread:$0]  %s1998_s0, 128, %s24_s30, [#allocation3]  }
  0x23   :  { %s1838_s28 = smov [#allocation7]   ;;  %s1839_s9 = smov [#allocation8]  }
  0x24   :  { %s45_s29 = sshll.u32 %s1838_s28, 4  ;;  %s54_s10 = sshll.u32 %s1839_s9, 4  ;;  %s46_s29 = int_to_ptr.vmem [resolvable:$true] %s45_s29  ;;  %s1915_s10 = int_to_ptr.vmem [resolvable:$true] %s54_s10 }
  0x25   :  { %s1762_s13 = scalar_lea.hbm %s2001_s3, 64 }
  0x26   :  { %p1763_p2 = scmp.ne.s32.totalorder %s2001_s3, %s1762_s13  ;;  %p1766_p3 = scmp.lt.u32.totalorder %s1762_s13, %s2001_s3 }
  0x28   :  { %p1768_p4 = pnand %p1766_p3, %p1763_p2 }
  0x2a   :  { %1771 = shalt.err (!%p1768_p4)
}
  0x2b   :  { %s1772_s0 = scalar_lea.vmem %s46_s29, 64  ;;  %p1777_p6 = scmp.lt.s32.totalorder %s46_s29, %s46_s29 }
  0x2c   :  { %p1773_p5 = scmp.ne.s32.totalorder %s46_s29, %s1772_s0  ;;  %p1778_p7 = scmp.lt.s32.totalorder %s1772_s0, %s1772_s0 }
  0x2e   :  { %p1779_p8 = por %p1778_p7, %p1777_p6 }
  0x30   :  { %p1780_p9 = pnand %p1779_p8, %p1773_p5 }
  0x32   :  { %1783 = shalt.err (!%p1780_p9)
}
  0x33   :  { %48 = dma.hbm_to_vmem [thread:$0]  %s2001_s3, 64, %s46_s29, [#allocation6]  }
  0x34   :  { %s1784_s21 = scalar_lea.hbm %s2002_s4, 16384 }
  0x35   :  { %p1785_p10 = scmp.ne.s32.totalorder %s2002_s4, %s1784_s21  ;;  %p1788_p11 = scmp.lt.u32.totalorder %s1784_s21, %s2002_s4 }
  0x37   :  { %p1790_p12 = pnand %p1788_p11, %p1785_p10 }
  0x39   :  { %1793 = shalt.err (!%p1790_p12)
}
  0x3a   :  { %s1794_s26 = scalar_lea.vmem %s1915_s10, 16384  ;;  %p1799_p0 = scmp.lt.s32.totalorder %s1915_s10, %s1915_s10 }
  0x3b   :  { %p1795_p13 = scmp.ne.s32.totalorder %s1915_s10, %s1794_s26  ;;  %p1800_p1 = scmp.lt.s32.totalorder %s1794_s26, %s1794_s26 }
  0x3d   :  { %p1801_p2 = por %p1800_p1, %p1799_p0 }
  0x3f   :  { %p1802_p3 = pnand %p1801_p2, %p1795_p13 }
  0x41   :  { %1805 = shalt.err (!%p1802_p3)
}
  0x42   :  { %s1840_s3 = smov 256   ;;  %s1841_s2 = smov 16  }
  0x43   :  { %60 = dma.hbm_to_vmem [thread:$0]  %s2002_s4, 16384, %s1915_s10, [#allocation9], %s1840_s3, %s1840_s3, %s1841_s2  }
  0x44   :  { %1828 = dma.done.wait [#allocation3], 128  }
  0x45   :  { %1829 = vsyncadd [#allocation3], 4294967168 }
  0x46   :  { %1830 = dma.done.wait [#allocation6], 576  }
  0x47   :  { %1831 = vsyncadd [#allocation6], 4294966720 }
  0x48   :  { %1832 = dma.done.wait [#allocation9], 16384  }
  0x49   :  { %1833 = vsyncadd [#allocation9], 4294950912  ;;  %v1842_v0 = vmov 0.0   ;;  %vm113_vm0 = vcmask 1044480   ;;  %v84_v1 = vld [vmem:[#allocation5 + $0x8] sm:$0x1f] }
  0x4a   :  { %190 = vmatprep.mubr.f32.mxu0 %v1842_v0  ;;  %261 = vmatprep.mubr.f32.mxu1 %v1842_v0  ;;  %v83_v2 = vld [vmem:[#allocation5] sm:$0x1f]  ;;  %v80_v3 = vld [vmem:[%s1999_s1] sm:$0xff]  ;;  %vm109_vm1 = vcmask 39936   ;;  %v85_v6 = vld [vmem:[#allocation5 + $0x10] sm:$0x1f] }
  0x4b   :  { %1366 = vmatprep.subr.msk.mxu0 %vm113_vm0, %v84_v1  ;;  %v81_v4 = vld [vmem:[#allocation2] sm:$0xff]  ;;  %v1525_v8 = vld [vmem:[#allocation8] ss:$16 sps:$4 sm:$0xff]   ;;  %v1530_v11 = vld [vmem:[#allocation8 + $0xc] ss:$16 sps:$4 sm:$0xff]   ;;  %vm1347_vm2 = vcmask 59392  }
  0x4c   :  { %v86_v5 = vld [vmem:[#allocation5 + $0x18] sm:$0x1f]  ;;  %1367 = vmatpush1.msk.msra.mxu0 %vm113_vm0, %v83_v2  ;;  %v82_v7 = vsub.f32 %v80_v3, %v81_v4  ;;  %v1531_v12 = vld [vmem:[#allocation8 + $0x20] ss:$16 sps:$4 sm:$0xff]   ;;  %v1536_v15 = vld [vmem:[#allocation8 + $0x2c] ss:$16 sps:$4 sm:$0xff]  }
  0x4d   :  { %1369 = vmatprep.subr.msk.mxu1 %vm113_vm0, %v86_v5  ;;  %v1527_v9 = vld [vmem:[#allocation8 + $0x4] ss:$16 sps:$4 sm:$0xff]   ;;  %v1528_v10 = vld [vmem:[#allocation8 + $0x8] ss:$16 sps:$4 sm:$0xff]   ;;  %v1537_v17 = vld [vmem:[#allocation8 + $0x40] ss:$16 sps:$4 sm:$0xff]  }
  0x4e   :  { %1370 = vmatpush1.msk.msra.mxu1 %vm113_vm0, %v85_v6  ;;  %1368 = vmatmul.mubr.msk.f32.vlgmr.msra.gmra.mrb[0].mxu0 %vm109_vm1, %v82_v7  ;;  %v1533_v13 = vld [vmem:[#allocation8 + $0x24] ss:$16 sps:$4 sm:$0xff]   ;;  %v1534_v14 = vld [vmem:[#allocation8 + $0x28] ss:$16 sps:$4 sm:$0xff]   ;;  %v1542_v18 = vld [vmem:[#allocation8 + $0x4c] ss:$16 sps:$4 sm:$0xff]  }
  0x4f   :  { %1371 = vmatmul.mubr.msk.f32.vlgmr.msra.gmra.mrb[0].mxu1 %vm109_vm1, %v82_v7  ;;  %1066 = vmatprep.subr.bf16.mxu0 %v1527_v9  ;;  %v1539_v16 = vld [vmem:[#allocation8 + $0x44] ss:$16 sps:$4 sm:$0xff]   ;;  %v1540_v19 = vld [vmem:[#allocation8 + $0x48] ss:$16 sps:$4 sm:$0xff]   ;;  %v1548_v21 = vld [vmem:[#allocation8 + $0x6c] ss:$16 sps:$4 sm:$0xff]  }
  0x50   :  { %1148 = vmatprep.subr.bf16.mxu1 %v1530_v11  ;;  %1067 = vmatpush1.bf16.msra.mxu0 %v1525_v8  ;;  %v1545_v20 = vld [vmem:[#allocation8 + $0x64] ss:$16 sps:$4 sm:$0xff]   ;;  %v1543_v22 = vld [vmem:[#allocation8 + $0x60] ss:$16 sps:$4 sm:$0xff]   ;;  %v1546_v23 = vld [vmem:[#allocation8 + $0x68] ss:$16 sps:$4 sm:$0xff]  }
  0x51   :  { %1149 = vmatpush1.bf16.msra.mxu1 %v1528_v10  ;;  %1068 = vmatprep.subr.bf16.mxu0 %v1533_v13  ;;  %v1551_v24 = vld [vmem:[#allocation8 + $0x84] ss:$16 sps:$4 sm:$0xff]   ;;  %v1554_v25 = vld [vmem:[#allocation8 + $0x8c] ss:$16 sps:$4 sm:$0xff]   ;;  %v1549_v26 = vld [vmem:[#allocation8 + $0x80] ss:$16 sps:$4 sm:$0xff]   ;;  %v89_v10 = vlaneseq }
  0x52   :  { %1150 = vmatprep.subr.bf16.mxu1 %v1536_v15  ;;  %v1552_v27 = vld [vmem:[#allocation8 + $0x88] ss:$16 sps:$4 sm:$0xff]   ;;  %v1557_v28 = vld [vmem:[#allocation8 + $0xa4] ss:$16 sps:$4 sm:$0xff]   ;;  %v1560_v29 = vld [vmem:[#allocation8 + $0xac] ss:$16 sps:$4 sm:$0xff]  }
  0x53   :  { %v1555_v30 = vld [vmem:[#allocation8 + $0xa0] ss:$16 sps:$4 sm:$0xff]   ;;  %v1558_v31 = vld [vmem:[#allocation8 + $0xa8] ss:$16 sps:$4 sm:$0xff]   ;;  %v1563_v32 = vld [vmem:[#allocation8 + $0xc4] ss:$16 sps:$4 sm:$0xff]  }
  0x54   :  { %1069 = vmatpush1.bf16.msra.mxu0 %v1531_v12  ;;  %v1566_v33 = vld [vmem:[#allocation8 + $0xcc] ss:$16 sps:$4 sm:$0xff]   ;;  %v1561_v34 = vld [vmem:[#allocation8 + $0xc0] ss:$16 sps:$4 sm:$0xff]   ;;  %v1564_v35 = vld [vmem:[#allocation8 + $0xc8] ss:$16 sps:$4 sm:$0xff]  }
  0x55   :  { %1151 = vmatpush1.bf16.msra.mxu1 %v1534_v14  ;;  %1070 = vmatprep.subr.bf16.mxu0 %v1539_v16  ;;  %v1569_v36 = vld [vmem:[#allocation8 + $0xe4] ss:$16 sps:$4 sm:$0xff]   ;;  %v1572_v37 = vld [vmem:[#allocation8 + $0xec] ss:$16 sps:$4 sm:$0xff]   ;;  %v1567_v38 = vld [vmem:[#allocation8 + $0xe0] ss:$16 sps:$4 sm:$0xff]  }
  0x56   :  { %1152 = vmatprep.subr.bf16.mxu1 %v1542_v18  ;;  %v1570_v39 = vld [vmem:[#allocation8 + $0xe8] ss:$16 sps:$4 sm:$0xff]   ;;  %v1575_v40 = vld [vmem:[#allocation8 + $0x104] ss:$16 sps:$4 sm:$0xff]   ;;  %v1578_v41 = vld [vmem:[#allocation8 + $0x10c] ss:$16 sps:$4 sm:$0xff]  }
  0x57   :  { %v1573_v42 = vld [vmem:[#allocation8 + $0x100] ss:$16 sps:$4 sm:$0xff]   ;;  %v1576_v43 = vld [vmem:[#allocation8 + $0x108] ss:$16 sps:$4 sm:$0xff]   ;;  %v1581_v44 = vld [vmem:[#allocation8 + $0x124] ss:$16 sps:$4 sm:$0xff]  }
  0x58   :  { %1071 = vmatpush1.bf16.msra.mxu0 %v1537_v17  ;;  %v1584_v45 = vld [vmem:[#allocation8 + $0x12c] ss:$16 sps:$4 sm:$0xff]   ;;  %v1579_v46 = vld [vmem:[#allocation8 + $0x120] ss:$16 sps:$4 sm:$0xff]   ;;  %v1582_v47 = vld [vmem:[#allocation8 + $0x128] ss:$16 sps:$4 sm:$0xff]  }
  0x59   :  { %1153 = vmatpush1.bf16.msra.mxu1 %v1540_v19  ;;  %1072 = vmatprep.subr.bf16.mxu0 %v1545_v20  ;;  %v1587_v48 = vld [vmem:[#allocation8 + $0x144] ss:$16 sps:$4 sm:$0xff]   ;;  %v1590_v49 = vld [vmem:[#allocation8 + $0x14c] ss:$16 sps:$4 sm:$0xff]   ;;  %v1585_v50 = vld [vmem:[#allocation8 + $0x140] ss:$16 sps:$4 sm:$0xff]  }
  0x5a   :  { %1154 = vmatprep.subr.bf16.mxu1 %v1548_v21  ;;  %v1588_v51 = vld [vmem:[#allocation8 + $0x148] ss:$16 sps:$4 sm:$0xff]   ;;  %v1593_v52 = vld [vmem:[#allocation8 + $0x164] ss:$16 sps:$4 sm:$0xff]   ;;  %v1596_v53 = vld [vmem:[#allocation8 + $0x16c] ss:$16 sps:$4 sm:$0xff]  }
  0x5b   :  { %v1591_v54 = vld [vmem:[#allocation8 + $0x160] ss:$16 sps:$4 sm:$0xff]   ;;  %v1594_v55 = vld [vmem:[#allocation8 + $0x168] ss:$16 sps:$4 sm:$0xff]   ;;  %v1599_v56 = vld [vmem:[#allocation8 + $0x184] ss:$16 sps:$4 sm:$0xff]  }
  0x5c   :  { %1073 = vmatpush1.bf16.msra.mxu0 %v1543_v22  ;;  %v1602_v57 = vld [vmem:[#allocation8 + $0x18c] ss:$16 sps:$4 sm:$0xff]   ;;  %v1597_v58 = vld [vmem:[#allocation8 + $0x180] ss:$16 sps:$4 sm:$0xff]   ;;  %v1600_v59 = vld [vmem:[#allocation8 + $0x188] ss:$16 sps:$4 sm:$0xff]  }
  0x5d   :  { %1155 = vmatpush1.bf16.msra.mxu1 %v1546_v23  ;;  %1074 = vmatprep.subr.bf16.mxu0 %v1551_v24  ;;  %v1605_v60 = vld [vmem:[#allocation8 + $0x1a4] ss:$16 sps:$4 sm:$0xff]   ;;  %v1608_v61 = vld [vmem:[#allocation8 + $0x1ac] ss:$16 sps:$4 sm:$0xff]   ;;  %v1603_v62 = vld [vmem:[#allocation8 + $0x1a0] ss:$16 sps:$4 sm:$0xff]  }
  0x5e   :  { %1156 = vmatprep.subr.bf16.mxu1 %v1554_v25  ;;  %v1606_v63 = vld [vmem:[#allocation8 + $0x1a8] ss:$16 sps:$4 sm:$0xff]   ;;  %v1611_v0 = vld [vmem:[#allocation8 + $0x1c4] ss:$16 sps:$4 sm:$0xff]   ;;  %v1614_v1 = vld [vmem:[#allocation8 + $0x1cc] ss:$16 sps:$4 sm:$0xff]  }
  0x5f   :  { %v1609_v2 = vld [vmem:[#allocation8 + $0x1c0] ss:$16 sps:$4 sm:$0xff]   ;;  %v1612_v3 = vld [vmem:[#allocation8 + $0x1c8] ss:$16 sps:$4 sm:$0xff]   ;;  %v1617_v4 = vld [vmem:[#allocation8 + $0x1e4] ss:$16 sps:$4 sm:$0xff]  }
  0x60   :  { %1075 = vmatpush1.bf16.msra.mxu0 %v1549_v26  ;;  %v1620_v5 = vld [vmem:[#allocation8 + $0x1ec] ss:$16 sps:$4 sm:$0xff]   ;;  %v1615_v6 = vld [vmem:[#allocation8 + $0x1e0] ss:$16 sps:$4 sm:$0xff]   ;;  %v1618_v7 = vld [vmem:[#allocation8 + $0x1e8] ss:$16 sps:$4 sm:$0xff]  }
  0x61   :  { %1157 = vmatpush1.bf16.msra.mxu1 %v1552_v27  ;;  %1076 = vmatprep.subr.bf16.mxu0 %v1557_v28  ;;  %v1623_v8 = vld [vmem:[#allocation8 + $0x204] ss:$16 sps:$4 sm:$0xff]   ;;  %v1626_v9 = vld [vmem:[#allocation8 + $0x20c] ss:$16 sps:$4 sm:$0xff]   ;;  %v1949_v11 = vshrl.u32 %v89_v10, 7 }
  0x62   :  { %1158 = vmatprep.subr.bf16.mxu1 %v1560_v29  ;;  %v1952_v13 = vld [vmem:[#allocation7] sm:$0xf]  ;;  %v1689_v10 = vld [vmem:[#allocation8 + $0x364] ss:$16 sps:$4 sm:$0xff]  }
  0x63   :  { %v91_v12 = vsub.s32 0, %v1949_v11  ;;  %v95_v14 = vsub.s32 1, %v1949_v11  ;;  %v103_v15 = vsub.s32 3, %v1949_v11 }
  0x64   :  { %1077 = vmatpush1.bf16.msra.mxu0 %v1555_v30  ;;  %v1621_v30 = vld [vmem:[#allocation8 + $0x200] ss:$16 sps:$4 sm:$0xff]  }
  0x65   :  { %1159 = vmatpush1.bf16.msra.mxu1 %v1558_v31  ;;  %1078 = vmatprep.subr.bf16.mxu0 %v1563_v32  ;;  %v92_v16 = vrot.slane %v1952_v13, %v91_v12  ;;  %v96_v17 = vrot.slane %v1952_v13, %v95_v14  ;;  %v104_v18 = vrot.slane %v1952_v13, %v103_v15  ;;  %v1624_v31 = vld [vmem:[#allocation8 + $0x208] ss:$16 sps:$4 sm:$0xff]  }
  0x66   :  { %1160 = vmatprep.subr.bf16.mxu1 %v1566_v33  ;;  %v1629_v33 = vld [vmem:[#allocation8 + $0x224] ss:$16 sps:$4 sm:$0xff]  }
  0x68   :  { %1079 = vmatpush1.bf16.msra.mxu0 %v1561_v34  ;;  %v1632_v34 = vld [vmem:[#allocation8 + $0x22c] ss:$16 sps:$4 sm:$0xff]  }
  0x69   :  { %1161 = vmatpush1.bf16.msra.mxu1 %v1564_v35  ;;  %1080 = vmatprep.subr.bf16.mxu0 %v1569_v36  ;;  %v1627_v36 = vld [vmem:[#allocation8 + $0x220] ss:$16 sps:$4 sm:$0xff]  }
  0x6a   :  { %1162 = vmatprep.subr.bf16.mxu1 %v1572_v37  ;;  %v1630_v37 = vld [vmem:[#allocation8 + $0x228] ss:$16 sps:$4 sm:$0xff]  }
  0x6c   :  { %1081 = vmatpush1.bf16.msra.mxu0 %v1567_v38  ;;  %v1635_v38 = vld [vmem:[#allocation8 + $0x244] ss:$16 sps:$4 sm:$0xff]  }
  0x6d   :  { %1163 = vmatpush1.bf16.msra.mxu1 %v1570_v39  ;;  %1082 = vmatprep.subr.bf16.mxu0 %v1575_v40  ;;  %v1638_v39 = vld [vmem:[#allocation8 + $0x24c] ss:$16 sps:$4 sm:$0xff]   ;;  %v1633_v40 = vld [vmem:[#allocation8 + $0x240] ss:$16 sps:$4 sm:$0xff]  }
  0x6e   :  { %1164 = vmatprep.subr.bf16.mxu1 %v1578_v41  ;;  %v1636_v41 = vld [vmem:[#allocation8 + $0x248] ss:$16 sps:$4 sm:$0xff]  }
  0x70   :  { %1083 = vmatpush1.bf16.msra.mxu0 %v1573_v42  ;;  %v1641_v42 = vld [vmem:[#allocation8 + $0x264] ss:$16 sps:$4 sm:$0xff]  }
  0x71   :  { %1165 = vmatpush1.bf16.msra.mxu1 %v1576_v43  ;;  %1084 = vmatprep.subr.bf16.mxu0 %v1581_v44  ;;  %v1644_v43 = vld [vmem:[#allocation8 + $0x26c] ss:$16 sps:$4 sm:$0xff]   ;;  %v1639_v44 = vld [vmem:[#allocation8 + $0x260] ss:$16 sps:$4 sm:$0xff]  }
  0x72   :  { %1166 = vmatprep.subr.bf16.mxu1 %v1584_v45  ;;  %v1642_v45 = vld [vmem:[#allocation8 + $0x268] ss:$16 sps:$4 sm:$0xff]  }
  0x74   :  { %1085 = vmatpush1.bf16.msra.mxu0 %v1579_v46  ;;  %v1647_v46 = vld [vmem:[#allocation8 + $0x284] ss:$16 sps:$4 sm:$0xff]  }
  0x75   :  { %1167 = vmatpush1.bf16.msra.mxu1 %v1582_v47  ;;  %1086 = vmatprep.subr.bf16.mxu0 %v1587_v48  ;;  %v1650_v47 = vld [vmem:[#allocation8 + $0x28c] ss:$16 sps:$4 sm:$0xff]   ;;  %v1645_v48 = vld [vmem:[#allocation8 + $0x280] ss:$16 sps:$4 sm:$0xff]  }
  0x76   :  { %1168 = vmatprep.subr.bf16.mxu1 %v1590_v49  ;;  %v1648_v49 = vld [vmem:[#allocation8 + $0x288] ss:$16 sps:$4 sm:$0xff]  }
  0x78   :  { %1087 = vmatpush1.bf16.msra.mxu0 %v1585_v50  ;;  %v1653_v50 = vld [vmem:[#allocation8 + $0x2a4] ss:$16 sps:$4 sm:$0xff]  }
  0x79   :  { %1169 = vmatpush1.bf16.msra.mxu1 %v1588_v51  ;;  %1088 = vmatprep.subr.bf16.mxu0 %v1593_v52  ;;  %v1656_v51 = vld [vmem:[#allocation8 + $0x2ac] ss:$16 sps:$4 sm:$0xff]   ;;  %v1651_v52 = vld [vmem:[#allocation8 + $0x2a0] ss:$16 sps:$4 sm:$0xff]  }
  0x7a   :  { %1170 = vmatprep.subr.bf16.mxu1 %v1596_v53  ;;  %v1654_v53 = vld [vmem:[#allocation8 + $0x2a8] ss:$16 sps:$4 sm:$0xff]  }
  0x7c   :  { %1089 = vmatpush1.bf16.msra.mxu0 %v1591_v54  ;;  %v1659_v54 = vld [vmem:[#allocation8 + $0x2c4] ss:$16 sps:$4 sm:$0xff]  }
  0x7d   :  { %1171 = vmatpush1.bf16.msra.mxu1 %v1594_v55  ;;  %1090 = vmatprep.subr.bf16.mxu0 %v1599_v56  ;;  %v1662_v55 = vld [vmem:[#allocation8 + $0x2cc] ss:$16 sps:$4 sm:$0xff]   ;;  %v1657_v56 = vld [vmem:[#allocation8 + $0x2c0] ss:$16 sps:$4 sm:$0xff]  }
  0x7e   :  { %1172 = vmatprep.subr.bf16.mxu1 %v1602_v57  ;;  %v1660_v57 = vld [vmem:[#allocation8 + $0x2c8] ss:$16 sps:$4 sm:$0xff]  }
  0x80   :  { %1091 = vmatpush1.bf16.msra.mxu0 %v1597_v58  ;;  %v1665_v58 = vld [vmem:[#allocation8 + $0x2e4] ss:$16 sps:$4 sm:$0xff]  }
  0x81   :  { %1173 = vmatpush1.bf16.msra.mxu1 %v1600_v59  ;;  %1092 = vmatprep.subr.bf16.mxu0 %v1605_v60  ;;  %v1668_v59 = vld [vmem:[#allocation8 + $0x2ec] ss:$16 sps:$4 sm:$0xff]   ;;  %v1663_v60 = vld [vmem:[#allocation8 + $0x2e0] ss:$16 sps:$4 sm:$0xff]  }
  0x82   :  { %1174 = vmatprep.subr.bf16.mxu1 %v1608_v61  ;;  %v1666_v61 = vld [vmem:[#allocation8 + $0x2e8] ss:$16 sps:$4 sm:$0xff]  }
  0x84   :  { %1093 = vmatpush1.bf16.msra.mxu0 %v1603_v62  ;;  %v1671_v62 = vld [vmem:[#allocation8 + $0x304] ss:$16 sps:$4 sm:$0xff]  }
  0x85   :  { %1175 = vmatpush1.bf16.msra.mxu1 %v1606_v63  ;;  %1094 = vmatprep.subr.bf16.mxu0 %v1611_v0  ;;  %v1674_v63 = vld [vmem:[#allocation8 + $0x30c] ss:$16 sps:$4 sm:$0xff]   ;;  %v1669_v0 = vld [vmem:[#allocation8 + $0x300] ss:$16 sps:$4 sm:$0xff]  }
  0x86   :  { %1176 = vmatprep.subr.bf16.mxu1 %v1614_v1  ;;  %v1672_v1 = vld [vmem:[#allocation8 + $0x308] ss:$16 sps:$4 sm:$0xff]  }
  0x88   :  { %1095 = vmatpush1.bf16.msra.mxu0 %v1609_v2  ;;  %v1677_v2 = vld [vmem:[#allocation8 + $0x324] ss:$16 sps:$4 sm:$0xff]  }
  0x89   :  { %1177 = vmatpush1.bf16.msra.mxu1 %v1612_v3  ;;  %1096 = vmatprep.subr.bf16.mxu0 %v1617_v4  ;;  %v1680_v3 = vld [vmem:[#allocation8 + $0x32c] ss:$16 sps:$4 sm:$0xff]   ;;  %v1675_v4 = vld [vmem:[#allocation8 + $0x320] ss:$16 sps:$4 sm:$0xff]  }
  0x8a   :  { %1178 = vmatprep.subr.bf16.mxu1 %v1620_v5  ;;  %v1678_v5 = vld [vmem:[#allocation8 + $0x328] ss:$16 sps:$4 sm:$0xff]  }
  0x8c   :  { %1097 = vmatpush1.bf16.msra.mxu0 %v1615_v6  ;;  %v1683_v6 = vld [vmem:[#allocation8 + $0x344] ss:$16 sps:$4 sm:$0xff]  }
  0x8d   :  { %1179 = vmatpush1.bf16.msra.mxu1 %v1618_v7  ;;  %1107 = vmatprep.subr.bf16.mxu0 %v1623_v8  ;;  %v1686_v7 = vld [vmem:[#allocation8 + $0x34c] ss:$16 sps:$4 sm:$0xff]   ;;  %v1681_v8 = vld [vmem:[#allocation8 + $0x340] ss:$16 sps:$4 sm:$0xff]  }
  0x8e   :  { %1189 = vmatprep.subr.bf16.mxu1 %v1626_v9  ;;  %v1684_v9 = vld [vmem:[#allocation8 + $0x348] ss:$16 sps:$4 sm:$0xff]  }
 0x121   :  { %v192_v19 = vpop.f32.mrb[0].mxu0 }
 0x122   :  { %v1965_v20 = vpop.f32.mrb[0].mxu1  ;;  %v193_v21 = vadd.f32 %v192_v19, %v92_v16  ;;  %v194_v22 = vpop.f32.mrb[1].mxu0  ;;  %v1692_v16 = vld [vmem:[#allocation8 + $0x36c] ss:$16 sps:$4 sm:$0xff]   ;;  %v1695_v19 = vld [vmem:[#allocation8 + $0x384] ss:$16 sps:$4 sm:$0xff]  }
 0x123   :  { %v265_v23 = vpop.f32.mrb[1].mxu1  ;;  %v195_v24 = vadd.f32 %v194_v22, %v96_v17  ;;  %v1687_v17 = vld [vmem:[#allocation8 + $0x360] ss:$16 sps:$4 sm:$0xff]  }
 0x124   :  { %v266_v25 = vadd.f32 %v265_v23, %v104_v18  ;;  %v268_v26 = vmax.f32 %v193_v21, 0.0  ;;  %v1690_v18 = vld [vmem:[#allocation8 + $0x368] ss:$16 sps:$4 sm:$0xff]   ;;  %v1698_v21 = vld [vmem:[#allocation8 + $0x38c] ss:$16 sps:$4 sm:$0xff]  }
 0x125   :  { %v269_v27 = vmax.f32 %v195_v24, 0.0  ;;  %v1693_v22 = vld [vmem:[#allocation8 + $0x380] ss:$16 sps:$4 sm:$0xff]   ;;  %v1696_v23 = vld [vmem:[#allocation8 + $0x388] ss:$16 sps:$4 sm:$0xff]  }
 0x126   :  { %v271_v28 = vmax.f32 %v266_v25, 0.0  ;;  %v272_v32 = vpack.c.bf16 %v268_v26, %v268_v26  ;;  %v1701_v24 = vld [vmem:[#allocation8 + $0x3a4] ss:$16 sps:$4 sm:$0xff]   ;;  %v1704_v25 = vld [vmem:[#allocation8 + $0x3ac] ss:$16 sps:$4 sm:$0xff]   ;;  %v99_v26 = vsub.s32 2, %v1949_v11 }
 0x127   :  { %v273_v29 = vpack.c.bf16 %v269_v27, %v269_v27  ;;  %v1699_v27 = vld [vmem:[#allocation8 + $0x3a0] ss:$16 sps:$4 sm:$0xff]  }
 0x128   :  { %v275_v35 = vpack.c.bf16 %v271_v28, %v271_v28  ;;  %v1702_v28 = vld [vmem:[#allocation8 + $0x3a8] ss:$16 sps:$4 sm:$0xff]  }
 0x129   :  { %1098 = vmatprep.mubr.bf16.mxu0 %v273_v29  ;;  %1180 = vmatprep.mubr.bf16.mxu1 %v273_v29  ;;  %v100_v29 = vrot.slane %v1952_v13, %v99_v26 }
 0x12a   :  { %1099 = vmatmul.mubr.bf16.vlgmr.msra.gmra.mrb[4].mxu0 %v272_v32  ;;  %1181 = vmatmul.mubr.bf16.vlgmr.msra.gmra.mrb[4].mxu1 %v272_v32  ;;  %v1705_v32 = vld [vmem:[#allocation8 + $0x3c0] ss:$16 sps:$4 sm:$0xff]  }
 0x12b   :  { %1108 = vmatpush1.bf16.msra.mxu0 %v1621_v30  ;;  %1190 = vmatpush1.bf16.msra.mxu1 %v1624_v31  ;;  %v1707_v30 = vld [vmem:[#allocation8 + $0x3c4] ss:$16 sps:$4 sm:$0xff]   ;;  %v1710_v31 = vld [vmem:[#allocation8 + $0x3cc] ss:$16 sps:$4 sm:$0xff]  }
 0x12c   :  { %1109 = vmatprep.subr.bf16.mxu0 %v1629_v33  ;;  %1191 = vmatprep.subr.bf16.mxu1 %v1632_v34  ;;  %v1708_v33 = vld [vmem:[#allocation8 + $0x3c8] ss:$16 sps:$4 sm:$0xff]   ;;  %v264_v34 = vadd.f32 %v1965_v20, %v100_v29 }
 0x12d   :  { %1139 = vmatprep.mubr.bf16.mxu0 %v275_v35  ;;  %1221 = vmatprep.mubr.bf16.mxu1 %v275_v35  ;;  %v1713_v35 = vld [vmem:[#allocation8 + $0x3e4] ss:$16 sps:$4 sm:$0xff]  }
 0x12e   :  { %v1234_v20 = vld [vmem:[%s2004_s6] sm:$0xff] }
 0x12f   :  { %1110 = vmatpush1.bf16.msra.mxu0 %v1627_v36  ;;  %1192 = vmatpush1.bf16.msra.mxu1 %v1630_v37  ;;  %v1716_v36 = vld [vmem:[#allocation8 + $0x3ec] ss:$16 sps:$4 sm:$0xff]   ;;  %v1711_v37 = vld [vmem:[#allocation8 + $0x3e0] ss:$16 sps:$4 sm:$0xff]  }
 0x130   :  { %1111 = vmatprep.subr.bf16.mxu0 %v1635_v38  ;;  %1193 = vmatprep.subr.bf16.mxu1 %v1638_v39  ;;  %v1714_v38 = vld [vmem:[#allocation8 + $0x3e8] ss:$16 sps:$4 sm:$0xff]   ;;  %v270_v39 = vmax.f32 %v264_v34, 0.0 }
 0x132   :  { %v274_v13 = vpack.c.bf16 %v270_v39, %v270_v39 }
 0x133   :  { %1112 = vmatpush1.bf16.msra.mxu0 %v1633_v40  ;;  %1194 = vmatpush1.bf16.msra.mxu1 %v1636_v41  ;;  %v1843_v40 = vmov 1983009808  }
 0x134   :  { %1113 = vmatprep.subr.bf16.mxu0 %v1641_v42  ;;  %1195 = vmatprep.subr.bf16.mxu1 %v1644_v43  ;;  %v1248_v41 = vunpack.c.l.s4 %v1843_v40 }
 0x136   :  { %v1249_v42 = vunpack.c.0.s8 %v1248_v41 }
 0x137   :  { %1114 = vmatpush1.bf16.msra.mxu0 %v1639_v44  ;;  %1196 = vmatpush1.bf16.msra.mxu1 %v1642_v45  ;;  %v1246_v44 = vcombine.high %v1234_v20, %v1234_v20 }
 0x138   :  { %1115 = vmatprep.subr.bf16.mxu0 %v1647_v46  ;;  %1197 = vmatprep.subr.bf16.mxu1 %v1650_v47  ;;  %v1252_v43 = vsub.s32 %v1249_v42, %v1949_v11 }
 0x13a   :  { %v1253_v45 = vrot.slane %v1234_v20, %v1252_v43  ;;  %v1260_v46 = vrot.slane %v1246_v44, %v1252_v43 }
 0x13b   :  { %1116 = vmatpush1.bf16.msra.mxu0 %v1645_v48  ;;  %1198 = vmatpush1.bf16.msra.mxu1 %v1648_v49  ;;  %v1239_v49 = vld [vmem:[%s2005_s7] sm:$0x7] }
 0x13c   :  { %1117 = vmatprep.subr.bf16.mxu0 %v1653_v50  ;;  %1199 = vmatprep.subr.bf16.mxu1 %v1656_v51  ;;  %v1261_v47 = vcombine.high %v1253_v45, %v1253_v45  ;;  %v1262_v48 = vcombine.high %v1260_v46, %v1260_v46  ;;  %v1844_v50 = vmov 0   ;;  %v404_v51 = vld [vmem:[%s2003_s5] sm:$0xf]  ;;  %s1845_s5 = smov [#allocation10]  }
 0x13d   :  { %1524 = vset.pattern.permute.xlu0 %v1844_v50  ;;  %s1355_s6 = sshll.u32 %s1845_s5, 4  ;;  %s1356_s6 = int_to_ptr.vmem [resolvable:$true] %s1355_s6 }
 0x13e   :  { %1242 = vperm.xlu0 %1524, %v1239_v49   ;;  %s1806_s7 = scalar_lea.vmem %s1356_s6, 64  ;;  %p1811_p5 = scmp.lt.s32.totalorder %s1356_s6, %s1356_s6 }
 0x13f   :  { %1118 = vmatpush1.bf16.msra.mxu0 %v1651_v52  ;;  %1200 = vmatpush1.bf16.msra.mxu1 %v1654_v53  ;;  %v409_v52 = vrot.slane %v404_v51, %v91_v12  ;;  %v417_v53 = vrot.slane %v404_v51, %v99_v26  ;;  %p1807_p4 = scmp.ne.s32.totalorder %s1356_s6, %s1806_s7  ;;  %p1812_p6 = scmp.lt.s32.totalorder %s1806_s7, %s1806_s7 }
 0x140   :  { %1119 = vmatprep.subr.bf16.mxu0 %v1659_v54  ;;  %1201 = vmatprep.subr.bf16.mxu1 %v1662_v55  ;;  %v413_v54 = vrot.slane %v404_v51, %v95_v14  ;;  %v421_v55 = vrot.slane %v404_v51, %v103_v15 }
 0x141   :  { %p1813_p7 = por %p1812_p6, %p1811_p5 }
 0x143   :  { %1120 = vmatpush1.bf16.msra.mxu0 %v1657_v56  ;;  %1202 = vmatpush1.bf16.msra.mxu1 %v1660_v57  ;;  %p1814_p8 = pnand %p1813_p7, %p1807_p4 }
 0x144   :  { %1121 = vmatprep.subr.bf16.mxu0 %v1665_v58  ;;  %1203 = vmatprep.subr.bf16.mxu1 %v1668_v59 }
 0x147   :  { %1122 = vmatpush1.bf16.msra.mxu0 %v1663_v60  ;;  %1204 = vmatpush1.bf16.msra.mxu1 %v1666_v61 }
 0x148   :  { %1123 = vmatprep.subr.bf16.mxu0 %v1671_v62  ;;  %1205 = vmatprep.subr.bf16.mxu1 %v1674_v63 }
 0x14b   :  { %1124 = vmatpush1.bf16.msra.mxu0 %v1669_v0  ;;  %1206 = vmatpush1.bf16.msra.mxu1 %v1672_v1 }
 0x14c   :  { %1125 = vmatprep.subr.bf16.mxu0 %v1677_v2  ;;  %1207 = vmatprep.subr.bf16.mxu1 %v1680_v3 }
 0x14f   :  { %1126 = vmatpush1.bf16.msra.mxu0 %v1675_v4  ;;  %1208 = vmatpush1.bf16.msra.mxu1 %v1678_v5 }
 0x150   :  { %1127 = vmatprep.subr.bf16.mxu0 %v1683_v6  ;;  %1209 = vmatprep.subr.bf16.mxu1 %v1686_v7 }
 0x153   :  { %1128 = vmatpush1.bf16.msra.mxu0 %v1681_v8  ;;  %1210 = vmatpush1.bf16.msra.mxu1 %v1684_v9 }
 0x154   :  { %1129 = vmatprep.subr.bf16.mxu0 %v1689_v10  ;;  %1211 = vmatprep.subr.bf16.mxu1 %v1692_v16 }
 0x157   :  { %1130 = vmatpush1.bf16.msra.mxu0 %v1687_v17  ;;  %1212 = vmatpush1.bf16.msra.mxu1 %v1690_v18 }
 0x158   :  { %1131 = vmatprep.subr.bf16.mxu0 %v1695_v19  ;;  %1213 = vmatprep.subr.bf16.mxu1 %v1698_v21 }
 0x15b   :  { %1132 = vmatpush1.bf16.msra.mxu0 %v1693_v22  ;;  %1214 = vmatpush1.bf16.msra.mxu1 %v1696_v23 }
 0x15c   :  { %1133 = vmatprep.subr.bf16.mxu0 %v1701_v24  ;;  %1215 = vmatprep.subr.bf16.mxu1 %v1704_v25 }
 0x15f   :  { %1134 = vmatpush1.bf16.msra.mxu0 %v1699_v27  ;;  %1216 = vmatpush1.bf16.msra.mxu1 %v1702_v28 }
 0x160   :  { %1135 = vmatprep.subr.bf16.mxu0 %v1707_v30  ;;  %1217 = vmatprep.subr.bf16.mxu1 %v1710_v31 }
 0x163   :  { %1136 = vmatpush1.bf16.msra.mxu0 %v1705_v32  ;;  %1218 = vmatpush1.bf16.msra.mxu1 %v1708_v33 }
 0x164   :  { %1137 = vmatprep.subr.bf16.mxu0 %v1713_v35  ;;  %1219 = vmatprep.subr.bf16.mxu1 %v1716_v36 }
 0x167   :  { %1138 = vmatpush1.bf16.msra.mxu0 %v1711_v37  ;;  %1220 = vmatpush1.bf16.msra.mxu1 %v1714_v38 }
 0x16a   :  { %1140 = vmatmul.mubr.bf16.vlgmr.msra.gmra.mrb[4].mxu0 %v274_v13  ;;  %1222 = vmatmul.mubr.bf16.vlgmr.msra.gmra.mrb[4].mxu1 %v274_v13 }
 0x16b   :  { %1299 = vmatprep.mubr.bf16.mxu1 %v1261_v47  ;;  %1339 = vmatprep.mubr.bf16.mxu0 %v1262_v48 }
 0x1bd   :  { %v1243_v8 = vpop.permute.xlu0 %1242 }
 0x23d   :  { %v1141_v56 = vpop.f32.mrb[4].mxu0  ;;  %v1223_v57 = vpop.f32.mrb[4].mxu1 }
 0x23e   :  { %v1500_v58 = vadd.f32 %v1141_v56, %v409_v52  ;;  %v1502_v59 = vadd.f32 %v1223_v57, %v417_v53  ;;  %v1143_v60 = vpop.f32.mrb[5].mxu0  ;;  %v1225_v61 = vpop.f32.mrb[5].mxu1 }
 0x23f   :  { %v1501_v62 = vadd.f32 %v1143_v60, %v413_v54  ;;  %v1503_v63 = vadd.f32 %v1225_v61, %v421_v55  ;;  %v1145_v0 = vpop.f32.mrb[6].mxu0  ;;  %v1227_v1 = vpop.f32.mrb[6].mxu1 }
 0x240   :  { %v1230_v2 = vmax.f32 %v1500_v58, 0.0  ;;  %v1232_v3 = vmax.f32 %v1502_v59, 0.0  ;;  %v1146_v12 = vpop.f32.mrb[7].mxu0  ;;  %v1228_v4 = vpop.f32.mrb[7].mxu1 }
 0x241   :  { %v1231_v5 = vmax.f32 %v1501_v62, 0.0  ;;  %v1233_v6 = vmax.f32 %v1503_v63, 0.0 }
 0x242   :  { %v1235_v11 = vpack.c.bf16 %v1230_v2, %v1230_v2  ;;  %v1237_v15 = vpack.c.bf16 %v1232_v3, %v1232_v3 }
 0x243   :  { %v1236_v14 = vpack.c.bf16 %v1231_v5, %v1231_v5  ;;  %v1238_v7 = vpack.c.bf16 %v1233_v6, %v1233_v6 }
 0x245   :  { %1267 = vmatprep.subr.bf16.mxu1 %v1236_v14  ;;  %1307 = vmatprep.subr.bf16.mxu0 %v1238_v7 }
 0x246   :  { %1268 = vmatpush1.bf16.xpose.msra.mxu1 %v1235_v11  ;;  %1308 = vmatpush1.bf16.xpose.msra.mxu0 %v1237_v15 }
 0x24d   :  { %1300 = vmatmul.mubr.bf16.vlgmr.msra.gmra.mrb[8].mxu1 %v1253_v45  ;;  %1340 = vmatmul.mubr.bf16.vlgmr.msra.gmra.mrb[8].mxu0 %v1260_v46 }
 0x320   :  { %v1301_v9 = vpop.f32.mrb[8].mxu1  ;;  %v1341_v10 = vpop.f32.mrb[8].mxu0 }
 0x321   :  { %v1302_v16 = vadd.f32 %v1301_v9, %v1243_v8  ;;  %v1303_v17 = vpop.f32.mrb[9].mxu1  ;;  %v1343_v18 = vpop.f32.mrb[9].mxu0 }
 0x322   :  { %v1304_v19 = vpop.f32.mrb[10].mxu1  ;;  %v1344_v21 = vpop.f32.mrb[10].mxu0 }
 0x323   :  { %v1342_v22 = vadd.f32 %v1341_v10, %v1302_v16  ;;  %v1305_v23 = vpop.f32.mrb[11].mxu1  ;;  %v1345_v24 = vpop.f32.mrb[11].mxu0 }
 0x325   :  { %1348 = vst.msk [vmem:[#allocation10] sm:$0x7] %vm1347_vm2, %v1342_v22 }
 0x326   :  { %1817 = shalt.err (!%p1814_p8)
}
 0x327   :  { %s1818_s16 = scalar_lea.hbm %s2006_s8, 64 }
 0x328   :  { %p1819_p9 = scmp.ne.s32.totalorder %s2006_s8, %s1818_s16  ;;  %p1822_p10 = scmp.lt.u32.totalorder %s1818_s16, %s2006_s8 }
 0x32a   :  { %p1824_p11 = pnand %p1822_p10, %p1819_p9 }
 0x32c   :  { %1827 = shalt.err (!%p1824_p11)
}
 0x32d   :  { %1358 = dma.vmem_to_hbm [thread:$0]  %s1356_s6, 64, %s2006_s8, [#allocation4]  }
 0x32e   :  { %1834 = dma.done.wait [#allocation4], 64  }
 0x32f   :  { %1835 = vsyncadd [#allocation4], 4294967232 }
 0x330   :  { %1362 = vsyncpa [#allocation3], 1 }
 0x331   :  { %1363 = vsyncpa [#allocation6], 1 }
 0x332   :  { %1364 = vsyncpa [#allocation9], 1 }
 0x333   :  { %1365 = vsyncpa [#allocation4], 1 }

</bundles_post_ra>
